<compile_context>
chip_gen: v7x
topology: tpu7x:2x2x1
jax: 0.10.0
libtpu: 0.0.40
codegen_flags: <defaults>
</compile_context>

<pallas_src>
import functools

import jax
import jax.numpy as jnp
import numpy as np
from jax import lax
from jax.experimental import pallas as pl
from jax.experimental.pallas import tpu as pltpu

EPS = 1e-5


# --------------------------------------------------------------------------
# Generation-aware VMEM budget.
# --------------------------------------------------------------------------
def _vmem_limit_bytes():
    """Scoped-VMEM budget: half of physical, capped at 64 MiB.
    -> 64 MiB on v5e/v6e (128 MiB physical), 32 MiB on v7x (64 MiB)."""
    try:
        cap = int(pltpu.get_tpu_info().vmem_capacity_bytes)
        return int(min(64 * 1024 * 1024, max(16 * 1024 * 1024, cap // 2)))
    except Exception:
        return 32 * 1024 * 1024           # conservative fallback (safe on v7x)


# --------------------------------------------------------------------------
# Pass 1 / 2 kernel (one grid step = NB images):
#   u  = prelu(x*s + t)                (s=1, t=0, alpha=1 -> identity, pass 1)
#   y  = conv3x3(u)                    (zero padding, no bias)
#   stats partial = [sum(y), sum(y*y)] per (w, c) lane for this block
# --------------------------------------------------------------------------
def _conv3x3_kernel(x_ref, s_ref, t_ref, alpha_ref, m0_ref, m2_ref, w_ref,
                    y_ref, stats_ref, *, NB, H, WC):
    M = NB * H

    # Fused previous-layer affine (folded train-mode BN) + PReLU, in f32.
    x = x_ref[...].reshape(M, WC).astype(jnp.float32)       # (M, WC)
    u = x * s_ref[...] + t_ref[...]                          # (1, WC) broadcasts
    u = jnp.where(u > 0, u, alpha_ref[...] * u)              # (1, 1) broadcasts
    u16 = u.astype(jnp.bfloat16)                             # single bf16 cast

    # Three lane-dense MXU contractions, one per kernel row ky.  The banded
    # (WC, WC) weights already encode the kx shift, the W-direction zero
    # padding and the channel mixing.
    yc = jnp.dot(u16, w_ref[1], preferred_element_type=jnp.float32)   # ky = 1
    if M > 1:
        y_up = jnp.dot(u16, w_ref[0], preferred_element_type=jnp.float32)  # ky = 0
        y_dn = jnp.dot(u16, w_ref[2], preferred_element_type=jnp.float32)  # ky = 2
        zrow = jnp.zeros((1, WC), jnp.float32)
        # ky=0 result of row r feeds output row r+1; ky=2 feeds row r-1.
        # m0/m2 zero the rows that would leak across per-image boundaries,
        # implementing the top / bottom zero padding of each image.
        yc = yc + jnp.concatenate([zrow, y_up[:M - 1, :]], axis=0) * m0_ref[...]
        yc = yc + jnp.concatenate([y_dn[1:, :], zrow], axis=0) * m2_ref[...]

    # Lane-dense bf16 store of the conv output.
    y_ref[...] = yc.reshape(NB, H, WC).astype(y_ref.dtype)

    # Per-grid-step BN partial statistics per (w, c) lane (final reduction
    # over w happens in the wrapper).  Distinct output block per step -> the
    # grid axis stays 'parallel' (no resident accumulator, no race on v7x).
    ps = jnp.sum(yc, axis=0, keepdims=True)                  # (1, WC)
    pss = jnp.sum(yc * yc, axis=0, keepdims=True)            # (1, WC)
    stats_ref[...] = jnp.concatenate([ps, pss], axis=0).reshape(1, 2, WC)


def _pick_nb(N, H, WC, in_bytes, vmem_limit):
    """Images per grid step: target ~512 matmul rows within a VMEM budget."""
    per_img = H * WC * (in_bytes + 2) * 2        # in + bf16 out, double-buffered
    cap = max(1, min(N, (vmem_limit // 4) // max(per_img, 1), max(1, 512 // H)))
    nb = 1
    for d in range(1, cap + 1):
        if N % d == 0:
            nb = d
    return nb


def _conv_pass(x, s_row, t_row, alpha, w_band):
    """y = conv3x3(prelu(x * s + t)) with zero padding; also returns per-block
    partial BN statistics of y (sum, sum of squares) per (w, c) lane."""
    N, H, WC = x.shape
    vlim = _vmem_limit_bytes()
    NB = _pick_nb(N, H, WC, x.dtype.itemsize, vlim)
    G = N // NB
    M = NB * H

    # Per-row masks implementing the per-image top/bottom zero padding.
    rows = np.arange(M) % H
    mask0 = jnp.asarray((rows != 0).astype(np.float32).reshape(M, 1))
    mask2 = jnp.asarray((rows != H - 1).astype(np.float32).reshape(M, 1))

    kernel = functools.partial(_conv3x3_kernel, NB=NB, H=H, WC=WC)
    y, stats = pl.pallas_call(
        kernel,
        out_shape=(jax.ShapeDtypeStruct((N, H, WC), jnp.bfloat16),
                   jax.ShapeDtypeStruct((G, 2, WC), jnp.float32)),
        grid_spec=pltpu.PrefetchScalarGridSpec(
            num_scalar_prefetch=0,
            grid=(G,),
            in_specs=[
                pl.BlockSpec((NB, H, WC), lambda i: (i, 0, 0)),   # x block
                pl.BlockSpec((1, WC), lambda i: (0, 0)),          # scale (tiled)
                pl.BlockSpec((1, WC), lambda i: (0, 0)),          # shift (tiled)
                pl.BlockSpec((1, 1), lambda i: (0, 0)),           # prelu alpha
                pl.BlockSpec((M, 1), lambda i: (0, 0)),           # row mask ky=0
                pl.BlockSpec((M, 1), lambda i: (0, 0)),           # row mask ky=2
                pl.BlockSpec((3, WC, WC), lambda i: (0, 0, 0)),   # banded weights
            ],
            out_specs=[
                pl.BlockSpec((NB, H, WC), lambda i: (i, 0, 0)),   # conv out (bf16)
                pl.BlockSpec((1, 2, WC), lambda i: (i, 0, 0)),    # stats partial
            ],
        ),
        compiler_params=pltpu.CompilerParams(
            dimension_semantics=("parallel",),     # partial stats -> race-free
            vmem_limit_bytes=vlim,
        ),
    )(x, s_row, t_row, alpha, mask0, mask2, w_band)
    return y, stats


# --------------------------------------------------------------------------
# BatchNorm fold (train mode, biased variance) from per-block partial stats.
# --------------------------------------------------------------------------
def _bn_fold(stats_partials, gamma, beta, count, W):
    total = jnp.sum(stats_partials, axis=0)            # (2, W*C) f32
    per_c = total.reshape(2, W, -1).sum(axis=1)        # (2, C)
    mean = per_c[0] / count
    # Single-pass variance in f32; clamp guards tiny negative round-off.
    var = jnp.maximum(per_c[1] / count - mean * mean, 0.0)
    scale = gamma * lax.rsqrt(var + EPS)
    shift = beta - mean * scale
    return scale, shift


# --------------------------------------------------------------------------
# Banded conv weights: fold kx shift + W-direction zero padding + channel
# mixing of the 3x3 conv into three (W*C, W*C) block-tridiagonal matrices.
# --------------------------------------------------------------------------
def _band_weights(w_hwio, W):
    mats = []
    for ky in range(3):
        m = 0.0
        for kx in range(3):
            # block (w_in, w_out) nonzero iff w_in == w_out + kx - 1
            m = m + jnp.kron(jnp.eye(W, k=1 - kx, dtype=jnp.float32),
                             w_hwio[ky, kx].astype(jnp.float32))
        mats.append(m)
    return jnp.stack(mats, axis=0).astype(jnp.bfloat16)       # (3, W*C, W*C)


# --------------------------------------------------------------------------
# Pass 3 kernel: lane-dense residual epilogue  out = x + y*s + t
# --------------------------------------------------------------------------
def _residual_kernel(x_ref, y_ref, s_ref, t_ref, out_ref):
    out_ref[...] = (x_ref[...] + y_ref[...].astype(jnp.float32) * s_ref[...]
                    + t_ref[...])


def _pick_rows(NH, WC, vmem_limit):
    """Largest legal row tile (divisor of NH, %8==0 or ==NH) under a VMEM budget."""
    per_row = WC * (4 + 2 + 4) * 2          # x f32 + y bf16 + out f32, 2 buffers
    cap = max(8, min(NH, 1024, (vmem_limit // 4) // max(per_row, 1)))
    best = None
    for d in range(1, min(NH, cap) + 1):
        if NH % d == 0 and (d % 8 == 0 or d == NH):
            best = d
    return best if best is not None else NH


def _residual_affine(x2d, y2d, s_row, t_row):
    NH, WC = x2d.shape
    vlim = _vmem_limit_bytes()
    rows = _pick_rows(NH, WC, vlim)
    return pl.pallas_call(
        _residual_kernel,
        out_shape=jax.ShapeDtypeStruct((NH, WC), jnp.float32),
        grid_spec=pltpu.PrefetchScalarGridSpec(
            num_scalar_prefetch=0,
            grid=(NH // rows,),
            in_specs=[
                pl.BlockSpec((rows, WC), lambda i: (i, 0)),
                pl.BlockSpec((rows, WC), lambda i: (i, 0)),
                pl.BlockSpec((1, WC), lambda i: (0, 0)),
                pl.BlockSpec((1, WC), lambda i: (0, 0)),
            ],
            out_specs=pl.BlockSpec((rows, WC), lambda i: (i, 0)),
        ),
        compiler_params=pltpu.CompilerParams(
            dimension_semantics=("parallel",),
            vmem_limit_bytes=vlim,
        ),
    )(x2d, y2d, s_row, t_row)


# --------------------------------------------------------------------------
# Full ResidualBlock forward.
# --------------------------------------------------------------------------
def residual_block_pallas(x_nchw, params):
    """x_nchw: (N, C, H, W) float32, PyTorch convention."""
    x_nhwc = jnp.transpose(x_nchw, (0, 2, 3, 1)).astype(jnp.float32)
    N, H, W, C = x_nhwc.shape
    WC = W * C
    count = N * H * W
    x3 = x_nhwc.reshape(N, H, WC)               # lane-dense (w, c) minor axis

    # Banded conv weights (bf16 MXU operands).  Conv biases b1/b2 deliberately
    # unused: a per-channel constant added before train-mode BatchNorm is
    # cancelled exactly by the mean subtraction.
    w1 = _band_weights(params["w1"], W)
    w2 = _band_weights(params["w2"], W)

    ones = jnp.ones((1, WC), jnp.float32)
    zeros = jnp.zeros((1, WC), jnp.float32)
    ident_alpha = jnp.ones((1, 1), jnp.float32)     # PReLU(alpha=1) == identity
    alpha = params["alpha"].reshape(1, 1).astype(jnp.float32)

    # Pass 1: y1 = conv1(x) (bf16) + per-block BN partial statistics of y1.
    y1, st1 = _conv_pass(x3, ones, zeros, ident_alpha, w1)
    s1, t1 = _bn_fold(st1, params["g1"], params["be1"], count, W)

    # Pass 2: y2 = conv2(prelu(bn1(y1))) (bf16) + partial statistics of y2
    # (bn1 folded into the pre-op of the conv kernel -> stats stay global).
    y2, st2 = _conv_pass(y1, jnp.tile(s1, W).reshape(1, WC),
                         jnp.tile(t1, W).reshape(1, WC), alpha, w2)
    s2, t2 = _bn_fold(st2, params["g2"], params["be2"], count, W)

    # Pass 3: lane-dense residual epilogue  out = x + y2*s2 + t2.
    # TODO(synk): when N*H*W*C (bf16) fits VMEM alongside the conv working set,
    # fold this into pass 2 (keep y2 resident) and drop the y2 HBM round trip.
    out2d = _residual_affine(x3.reshape(N * H, WC), y2.reshape(N * H, WC),
                             jnp.tile(s2, W).reshape(1, WC),
                             jnp.tile(t2, W).reshape(1, WC))
    out = out2d.reshape(N, H, W, C)
    return jnp.transpose(out, (0, 3, 1, 2))        # back to NCHW


# ---------------- pure-JAX reference (faithful PyTorch semantics) -----------
def residual_block_ref(x_nchw, params):
    x = jnp.transpose(x_nchw, (0, 2, 3, 1)).astype(jnp.float32)

    def conv(y, w, b):
        out = lax.conv_general_dilated(
            y, w, window_strides=(1, 1), padding="SAME",
            dimension_numbers=("NHWC", "HWIO", "NHWC"))
        return out + b.reshape(1, 1, 1, -1)

    def bn(y, g, be):
        mean = jnp.mean(y, axis=(0, 1, 2), keepdims=True)
        var = jnp.mean((y - mean) ** 2, axis=(0, 1, 2), keepdims=True)
        return (y - mean) * lax.rsqrt(var + EPS) * g.reshape(1, 1, 1, -1) \
               + be.reshape(1, 1, 1, -1)

    h = bn(conv(x, params["w1"], params["b1"]), params["g1"], params["be1"])
    a = params["alpha"][0]
    h = jnp.where(h > 0, h, a * h)
    r = bn(conv(h, params["w2"], params["b2"]), params["g2"], params["be2"])
    return jnp.transpose(x + r, (0, 3, 1, 2))


def make_params(key, C):
    ks = jax.random.split(key, 8)
    return {
        "w1": 0.1 * jax.random.normal(ks[0], (3, 3, C, C), jnp.float32),
        "b1": 0.05 * jax.random.normal(ks[1], (C,), jnp.float32),
        "g1": 1.0 + 0.1 * jax.random.normal(ks[2], (C,), jnp.float32),
        "be1": 0.1 * jax.random.normal(ks[3], (C,), jnp.float32),
        "alpha": jnp.array([0.25], jnp.float32),      # PReLU default init
        "w2": 0.1 * jax.random.normal(ks[4], (3, 3, C, C), jnp.float32),
        "b2": 0.05 * jax.random.normal(ks[5], (C,), jnp.float32),
        "g2": 1.0 + 0.1 * jax.random.normal(ks[6], (C,), jnp.float32),
        "be2": 0.1 * jax.random.normal(ks[7], (C,), jnp.float32),
    }


if __name__ == "__main__":
    key = jax.random.PRNGKey(0)
    k_x, k_p = jax.random.split(key)

    # Small SRGAN-like shape; W*C = 128 keeps every pass fully lane-dense.
    N, C, H, W = 2, 16, 8, 8
    x = jax.random.normal(k_x, (N, C, H, W), jnp.float32)   # NCHW like PyTorch
    params = make_params(k_p, C)

    out = jax.block_until_ready(residual_block_pallas(x, params))
    ref = jax.block_until_ready(residual_block_ref(x, params))

    # Tolerance sized for the end-to-end bf16 pipeline (bf16 MXU operands with
    # f32 accumulation + bf16 y1/y2 intermediates).
    np.testing.assert_allclose(np.asarray(out), np.asarray(ref),
                               rtol=5e-2, atol=5e-2)

    print("KERNEL_OK")
</pallas_src>

<mosaic_0001>
module attributes {stable_mosaic.version = 11 : i64} {
  func.func @_conv3x3_kernel(%arg0: i32, %arg1: memref<2x8x128xf32, #tpu.memory_space<vmem>>, %arg2: memref<1x128xf32, #tpu.memory_space<vmem>>, %arg3: memref<1x128xf32, #tpu.memory_space<vmem>>, %arg4: memref<1x1xf32, #tpu.memory_space<vmem>>, %arg5: memref<16x1xf32, #tpu.memory_space<vmem>>, %arg6: memref<16x1xf32, #tpu.memory_space<vmem>>, %arg7: memref<3x128x128xbf16, #tpu.memory_space<vmem>>, %arg8: memref<2x8x128xbf16, #tpu.memory_space<vmem>>, %arg9: memref<1x2x128xf32, #tpu.memory_space<vmem>>) attributes {dimension_semantics = [#tpu.dimension_semantics<parallel>], iteration_bounds = array<i64: 1>, scalar_prefetch = 0 : i64, scratch_operands = 0 : i64, tpu.core_type = #tpu.core_type<tc>, window_params = [{transform_indices = @transform_0, window_bounds = array<i64: 2, 8, 128>}, {pipeline_mode = #tpu.pipeline_mode<synchronous>, transform_indices = @transform_1, window_bounds = array<i64: 1, 128>}, {pipeline_mode = #tpu.pipeline_mode<synchronous>, transform_indices = @transform_2, window_bounds = array<i64: 1, 128>}, {pipeline_mode = #tpu.pipeline_mode<synchronous>, transform_indices = @transform_3, window_bounds = array<i64: 1, 1>}, {pipeline_mode = #tpu.pipeline_mode<synchronous>, transform_indices = @transform_4, window_bounds = array<i64: 16, 1>}, {pipeline_mode = #tpu.pipeline_mode<synchronous>, transform_indices = @transform_5, window_bounds = array<i64: 16, 1>}, {pipeline_mode = #tpu.pipeline_mode<synchronous>, transform_indices = @transform_6, window_bounds = array<i64: 3, 128, 128>}, {transform_indices = @transform_7, window_bounds = array<i64: 2, 8, 128>}, {transform_indices = @transform_8, window_bounds = array<i64: 1, 2, 128>}]} {
    %c0 = arith.constant 0 : index
    %c0_0 = arith.constant 0 : index
    %c0_1 = arith.constant 0 : index
    %0 = vector.load %arg1[%c0, %c0_0, %c0_1] : memref<2x8x128xf32, #tpu.memory_space<vmem>>, vector<2x8x128xf32>
    %1 = vector.shape_cast %0 : vector<2x8x128xf32> to vector<16x128xf32>
    %c0_2 = arith.constant 0 : index
    %c0_3 = arith.constant 0 : index
    %2 = vector.load %arg2[%c0_2, %c0_3] : memref<1x128xf32, #tpu.memory_space<vmem>>, vector<1x128xf32>
    %3 = vector.broadcast %2 : vector<1x128xf32> to vector<16x128xf32>
    %4 = arith.mulf %1, %3 : vector<16x128xf32>
    %c0_4 = arith.constant 0 : index
    %c0_5 = arith.constant 0 : index
    %5 = vector.load %arg3[%c0_4, %c0_5] : memref<1x128xf32, #tpu.memory_space<vmem>>, vector<1x128xf32>
    %6 = vector.broadcast %5 : vector<1x128xf32> to vector<16x128xf32>
    %7 = arith.addf %4, %6 : vector<16x128xf32>
    %cst = arith.constant 0.000000e+00 : f32
    %8 = vector.broadcast %cst : f32 to vector<16x128xf32>
    %9 = arith.cmpf ogt, %7, %8 : vector<16x128xf32>
    %c0_6 = arith.constant 0 : index
    %c0_7 = arith.constant 0 : index
    %10 = vector.load %arg4[%c0_6, %c0_7] : memref<1x1xf32, #tpu.memory_space<vmem>>, vector<1x1xf32>
    %11 = vector.broadcast %10 : vector<1x1xf32> to vector<16x128xf32>
    %12 = arith.mulf %11, %7 : vector<16x128xf32>
    %13 = arith.select %9, %7, %12 : vector<16x128xi1>, vector<16x128xf32>
    %14 = arith.truncf %13 : vector<16x128xf32> to vector<16x128xbf16>
    %c1 = arith.constant 1 : index
    %c0_8 = arith.constant 0 : index
    %c0_9 = arith.constant 0 : index
    %15 = vector.load %arg7[%c1, %c0_8, %c0_9] : memref<3x128x128xbf16, #tpu.memory_space<vmem>>, vector<1x128x128xbf16>
    %16 = vector.shape_cast %15 : vector<1x128x128xbf16> to vector<128x128xbf16>
    %cst_10 = arith.constant dense<0.000000e+00> : vector<16x128xf32>
    %17 = tpu.matmul %14, %16, %cst_10 {dimension_numbers = #tpu.dot_dimension_numbers<[1], [0], [0], [1], [0, 0, 1, 1], [], []>} : vector<16x128xbf16>, vector<128x128xbf16>, vector<16x128xf32> -> vector<16x128xf32>
    %c0_11 = arith.constant 0 : index
    %c0_12 = arith.constant 0 : index
    %c0_13 = arith.constant 0 : index
    %18 = vector.load %arg7[%c0_11, %c0_12, %c0_13] : memref<3x128x128xbf16, #tpu.memory_space<vmem>>, vector<1x128x128xbf16>
    %19 = vector.shape_cast %18 : vector<1x128x128xbf16> to vector<128x128xbf16>
    %cst_14 = arith.constant dense<0.000000e+00> : vector<16x128xf32>
    %20 = tpu.matmul %14, %19, %cst_14 {dimension_numbers = #tpu.dot_dimension_numbers<[1], [0], [0], [1], [0, 0, 1, 1], [], []>} : vector<16x128xbf16>, vector<128x128xbf16>, vector<16x128xf32> -> vector<16x128xf32>
    %c2 = arith.constant 2 : index
    %c0_15 = arith.constant 0 : index
    %c0_16 = arith.constant 0 : index
    %21 = vector.load %arg7[%c2, %c0_15, %c0_16] : memref<3x128x128xbf16, #tpu.memory_space<vmem>>, vector<1x128x128xbf16>
    %22 = vector.shape_cast %21 : vector<1x128x128xbf16> to vector<128x128xbf16>
    %cst_17 = arith.constant dense<0.000000e+00> : vector<16x128xf32>
    %23 = tpu.matmul %14, %22, %cst_17 {dimension_numbers = #tpu.dot_dimension_numbers<[1], [0], [0], [1], [0, 0, 1, 1], [], []>} : vector<16x128xbf16>, vector<128x128xbf16>, vector<16x128xf32> -> vector<16x128xf32>
    %cst_18 = arith.constant 0.000000e+00 : f32
    %24 = vector.broadcast %cst_18 : f32 to vector<1x128xf32>
    %25 = vector.extract_strided_slice %20 {offsets = [0, 0], sizes = [15, 128], strides = [1, 1]} : vector<16x128xf32> to vector<15x128xf32>
    %26 = tpu.concatenate %24, %25 in 0 : vector<1x128xf32>, vector<15x128xf32> -> vector<16x128xf32>
    %c0_19 = arith.constant 0 : index
    %c0_20 = arith.constant 0 : index
    %27 = vector.load %arg5[%c0_19, %c0_20] : memref<16x1xf32, #tpu.memory_space<vmem>>, vector<16x1xf32>
    %28 = vector.broadcast %27 : vector<16x1xf32> to vector<16x128xf32>
    %29 = arith.mulf %26, %28 : vector<16x128xf32>
    %30 = arith.addf %17, %29 : vector<16x128xf32>
    %31 = vector.extract_strided_slice %23 {offsets = [1, 0], sizes = [15, 128], strides = [1, 1]} : vector<16x128xf32> to vector<15x128xf32>
    %32 = tpu.concatenate %31, %24 in 0 : vector<15x128xf32>, vector<1x128xf32> -> vector<16x128xf32>
    %c0_21 = arith.constant 0 : index
    %c0_22 = arith.constant 0 : index
    %33 = vector.load %arg6[%c0_21, %c0_22] : memref<16x1xf32, #tpu.memory_space<vmem>>, vector<16x1xf32>
    %34 = vector.broadcast %33 : vector<16x1xf32> to vector<16x128xf32>
    %35 = arith.mulf %32, %34 : vector<16x128xf32>
    %36 = arith.addf %30, %35 : vector<16x128xf32>
    %37 = vector.shape_cast %36 : vector<16x128xf32> to vector<2x8x128xf32>
    %38 = arith.truncf %37 : vector<2x8x128xf32> to vector<2x8x128xbf16>
    %c0_23 = arith.constant 0 : index
    %c0_24 = arith.constant 0 : index
    %c0_25 = arith.constant 0 : index
    %39 = vector.load %arg8[%c0_23, %c0_24, %c0_25] : memref<2x8x128xbf16, #tpu.memory_space<vmem>>, vector<2x8x128xbf16>
    tpu.vector_store %arg8[%c0_23, %c0_24, %c0_25], %38 {strides = array<i32>} : memref<2x8x128xbf16, #tpu.memory_space<vmem>>, vector<2x8x128xbf16>,
    %cst_26 = arith.constant dense<0.000000e+00> : vector<128xf32>
    %40 = vector.multi_reduction <add>, %36, %cst_26 [0] : vector<16x128xf32> to vector<128xf32>
    %41 = vector.shape_cast %40 : vector<128xf32> to vector<1x128xf32>
    %42 = arith.mulf %36, %36 : vector<16x128xf32>
    %cst_27 = arith.constant dense<0.000000e+00> : vector<128xf32>
    %43 = vector.multi_reduction <add>, %42, %cst_27 [0] : vector<16x128xf32> to vector<128xf32>
    %44 = vector.shape_cast %43 : vector<128xf32> to vector<1x128xf32>
    %45 = tpu.concatenate %41, %44 in 0 : vector<1x128xf32>, vector<1x128xf32> -> vector<2x128xf32>
    %46 = vector.shape_cast %45 : vector<2x128xf32> to vector<1x2x128xf32>
    %c0_28 = arith.constant 0 : index
    %c0_29 = arith.constant 0 : index
    %c0_30 = arith.constant 0 : index
    %47 = vector.load %arg9[%c0_28, %c0_29, %c0_30] : memref<1x2x128xf32, #tpu.memory_space<vmem>>, vector<1x2x128xf32>
    tpu.vector_store %arg9[%c0_28, %c0_29, %c0_30], %46 {strides = array<i32>} : memref<1x2x128xf32, #tpu.memory_space<vmem>>, vector<1x2x128xf32>,
    return
  }
  func.func @transform_0(%arg0: i32) -> (i32, i32, i32) {
    %c0_i32 = arith.constant 0 : i32
    %c0_i32_0 = arith.constant 0 : i32
    %c0_i32_1 = arith.constant 0 : i32
    return %arg0, %c0_i32, %c0_i32_0 : i32, i32, i32
  }
  func.func @transform_1(%arg0: i32) -> (i32, i32) {
    %c0_i32 = arith.constant 0 : i32
    %c0_i32_0 = arith.constant 0 : i32
    %c0_i32_1 = arith.constant 0 : i32
    return %c0_i32, %c0_i32_0 : i32, i32
  }
  func.func @transform_2(%arg0: i32) -> (i32, i32) {
    %c0_i32 = arith.constant 0 : i32
    %c0_i32_0 = arith.constant 0 : i32
    %c0_i32_1 = arith.constant 0 : i32
    return %c0_i32, %c0_i32_0 : i32, i32
  }
  func.func @transform_3(%arg0: i32) -> (i32, i32) {
    %c0_i32 = arith.constant 0 : i32
    %c0_i32_0 = arith.constant 0 : i32
    %c0_i32_1 = arith.constant 0 : i32
    return %c0_i32, %c0_i32_0 : i32, i32
  }
  func.func @transform_4(%arg0: i32) -> (i32, i32) {
    %c0_i32 = arith.constant 0 : i32
    %c0_i32_0 = arith.constant 0 : i32
    %c0_i32_1 = arith.constant 0 : i32
    return %c0_i32, %c0_i32_0 : i32, i32
  }
  func.func @transform_5(%arg0: i32) -> (i32, i32) {
    %c0_i32 = arith.constant 0 : i32
    %c0_i32_0 = arith.constant 0 : i32
    %c0_i32_1 = arith.constant 0 : i32
    return %c0_i32, %c0_i32_0 : i32, i32
  }
  func.func @transform_6(%arg0: i32) -> (i32, i32, i32) {
    %c0_i32 = arith.constant 0 : i32
    %c0_i32_0 = arith.constant 0 : i32
    %c0_i32_1 = arith.constant 0 : i32
    %c0_i32_2 = arith.constant 0 : i32
    return %c0_i32, %c0_i32_0, %c0_i32_1 : i32, i32, i32
  }
  func.func @transform_7(%arg0: i32) -> (i32, i32, i32) {
    %c0_i32 = arith.constant 0 : i32
    %c0_i32_0 = arith.constant 0 : i32
    %c0_i32_1 = arith.constant 0 : i32
    return %arg0, %c0_i32, %c0_i32_0 : i32, i32, i32
  }
  func.func @transform_8(%arg0: i32) -> (i32, i32, i32) {
    %c0_i32 = arith.constant 0 : i32
    %c0_i32_0 = arith.constant 0 : i32
    %c0_i32_1 = arith.constant 0 : i32
    return %arg0, %c0_i32, %c0_i32_0 : i32, i32, i32
  }
}

</mosaic_0001>

<bundles_post_ra>
// kernel: tpu_custom_call.1
= control target key start
LH: loop header
LB: loop body
LE: loop exit
PB: predicated region body
PF: predicated region fallthrough
CT: control target
= control target key end

     0   :  { %s882_s0 = inlined_call_operand.vmem [shape: f32[2,8,128], index: 0, kind: input, shape index: {}]   ;;  %s883_s1 = inlined_call_operand.vmem [shape: f32[1,128], index: 1, kind: input, shape index: {}]   ;;  %s884_s2 = inlined_call_operand.vmem [shape: f32[1,128], index: 2, kind: input, shape index: {}]   ;;  %s885_s3 = inlined_call_operand.<no memory space> [shape: f32[1,1], index: 3, kind: input, shape index: {}]   ;;  %s886_s4 = inlined_call_operand.vmem [shape: f32[16,1], index: 4, kind: input, shape index: {}]   ;;  %s887_s5 = inlined_call_operand.vmem [shape: f32[16,1], index: 5, kind: input, shape index: {}]   ;;  %s888_s6 = inlined_call_operand.hbm [shape: bf16[3,128,128], index: 6, kind: input, shape index: {}]   ;;  %s889_s7 = inlined_call_operand.hbm [shape: bf16[2,8,128], index: 7, kind: output, shape index: {0}]   ;;  %s890_s8 = inlined_call_operand.hbm [shape: f32[1,2,128], index: 8, kind: output, shape index: {1}]  }
   0x1   :  { %v14_v0 = vstv %s885_s3 }
   0x2   :  { %15 = vst [vmem:[#allocation2] sm:$0x1] %v14_v0 }
   0x3   :  { %16 = vsyncpa [#allocation4], 0 }
   0x4   :  { %17 = vsyncpa [#allocation5], 0 }
   0x5   :  { %18 = vsyncpa [#allocation8], 0  ;;  %s727_s29 = smov [#allocation3]   ;;  %s655_s11 = scalar_lea.hbm %s888_s6, 3072 }
   0x6   :  { %s36_s30 = sshll.u32 %s727_s29, 4  ;;  %p656_p0 = scmp.ne.s32.totalorder %s888_s6, %s655_s11  ;;  %s37_s30 = int_to_ptr.vmem [resolvable:$true] %s36_s30 }
   0x7   :  { %p659_p1 = scmp.lt.u32.totalorder %s655_s11, %s888_s6 }
   0x9   :  { %p661_p2 = pnand %p659_p1, %p656_p0 }
   0xb   :  { %664 = shalt.err (!%p661_p2)
}
   0xc   :  { %s665_s3 = scalar_lea.vmem %s37_s30, 3072  ;;  %p670_p4 = scmp.lt.s32.totalorder %s37_s30, %s37_s30 }
   0xd   :  { %p666_p3 = scmp.ne.s32.totalorder %s37_s30, %s665_s3  ;;  %p671_p5 = scmp.lt.s32.totalorder %s665_s3, %s665_s3 }
   0xf   :  { %p672_p6 = por %p671_p5, %p670_p4 }
  0x11   :  { %p673_p7 = pnand %p672_p6, %p666_p3 }
  0x13   :  { %676 = shalt.err (!%p673_p7)
}
  0x14   :  { %s728_s16 = smov 64   ;;  %s729_s17 = smov 4  }
  0x15   :  { %42 = dma.hbm_to_vmem [thread:$0]  %s888_s6, 3072, %s37_s30, [#allocation4], %s728_s16, %s728_s16, %s729_s17  }
  0x16   :  { %721 = dma.done.wait [#allocation4], 3072  }
  0x17   :  { %722 = vsyncadd [#allocation4], 4294964224  ;;  %v730_v1 = vmov 0   ;;  %v731_v2 = vmov 0.0   ;;  %v504_v3 = vld [vmem:[#allocation2] ss:$0 sm:$0xff] }
  0x18   :  { %629 = vset.pattern.permute.xlu0 %v730_v1  ;;  %561 = vmatprep.subr.bf16.mxu0 %v731_v2  ;;  %v321_v4 = vld [vmem:[%s886_s4] sm:$0xff]  ;;  %v633_v7 = vld [vmem:[#allocation3 + $0x8] sm:$0xff]   ;;  %vm732_vm0 = vmmov 0   ;;  %v635_v10 = vld [vmem:[#allocation3 + $0x10] sm:$0xff]   ;;  %vm426_vm3 = vcmask 1046528   ;;  %vm314_vm4 = vcmask 1040384  }
  0x19   :  { %581 = vmatprep.subr.bf16.mxu1 %v731_v2  ;;  %630 = vset.pattern.permute.xlu1 %v730_v1  ;;  %v631_v5 = vld [vmem:[#allocation3] sm:$0xff]   ;;  %v634_v8 = vld [vmem:[#allocation3 + $0x88] sm:$0xff]   ;;  %v636_v11 = vld [vmem:[#allocation3 + $0x90] sm:$0xff]  }
  0x1a   :  { %76 = vperm.xlu0 %629, %v504_v3   ;;  %v632_v6 = vld [vmem:[#allocation3 + $0x80] sm:$0xff]   ;;  %562 = vmatpush3.bf16.msra.mxu0 %v631_v5  ;;  %v637_v12 = vld [vmem:[#allocation3 + $0x18] sm:$0xff]   ;;  %v641_v16 = vld [vmem:[#allocation3 + $0x28] sm:$0xff]  }
  0x1b   :  { %582 = vmatpush3.bf16.msra.mxu1 %v632_v6  ;;  %563 = vmatprep.subr.bf16.mxu0 %v731_v2  ;;  %v434_v9 = vld [vmem:[%s887_s5 + $0x8] sm:$0xff]  ;;  %v638_v13 = vld [vmem:[#allocation3 + $0x98] sm:$0xff]   ;;  %v643_v18 = vld [vmem:[#allocation3 + $0x30] sm:$0xff]  }
  0x1c   :  { %583 = vmatprep.subr.bf16.mxu1 %v731_v2  ;;  %577 = vmatprep.mubr.msk.bf16.mxu0 %vm732_vm0, %v731_v2  ;;  %v639_v14 = vld [vmem:[#allocation3 + $0x20] sm:$0xff]   ;;  %v642_v17 = vld [vmem:[#allocation3 + $0xa8] sm:$0xff]   ;;  %v644_v19 = vld [vmem:[#allocation3 + $0xb0] sm:$0xff]  }
  0x1d   :  { %597 = vmatprep.mubr.msk.bf16.mxu1 %vm732_vm0, %v731_v2  ;;  %v640_v15 = vld [vmem:[#allocation3 + $0xa0] sm:$0xff]   ;;  %v645_v20 = vld [vmem:[#allocation3 + $0x38] sm:$0xff]   ;;  %v648_v39 = vld [vmem:[#allocation3 + $0x48] sm:$0xff]  }
  0x1e   :  { %325 = vperm.xlu0 %629, %v321_v4   ;;  %564 = vmatpush3.bf16.msra.mxu0 %v633_v7  ;;  %v646_v21 = vld [vmem:[#allocation3 + $0xb8] sm:$0xff]   ;;  %v322_v22 = vld [vmem:[%s886_s4 + $0x8] sm:$0xff]  ;;  %v649_v40 = vld [vmem:[#allocation3 + $0x50] sm:$0xff]  }
  0x1f   :  { %584 = vmatpush3.bf16.msra.mxu1 %v634_v8  ;;  %565 = vmatprep.subr.bf16.mxu0 %v731_v2  ;;  %v433_v23 = vld [vmem:[%s887_s5] sm:$0xff]  ;;  %v48_v25 = vld [vmem:[%s882_s0 + $0x8] sm:$0xff]  ;;  %v653_v44 = vld [vmem:[#allocation3 + $0x70] sm:$0xff]  }
  0x20   :  { %585 = vmatprep.subr.bf16.mxu1 %v731_v2  ;;  %330 = vperm.xlu1 %630, %v322_v22   ;;  %v47_v24 = vld [vmem:[%s882_s0] sm:$0xff]  ;;  %v652_v43 = vld [vmem:[#allocation3 + $0x68] sm:$0xff]   ;;  %s733_s0 = smov [#allocation6]  }
  0x21   :  { %v502_v26 = vld [vmem:[%s883_s1] ss:$0 sm:$0xff]  ;;  %v647_v37 = vld [vmem:[#allocation3 + $0x40] sm:$0xff]   ;;  %s476_s1 = sshll.u32 %s733_s0, 4  ;;  %s477_s1 = int_to_ptr.vmem [resolvable:$true] %s476_s1 }
  0x22   :  { %442 = vperm.xlu0 %629, %v434_v9   ;;  %566 = vmatpush3.bf16.msra.mxu0 %v635_v10  ;;  %v56_v27 = vmul.f32 %v502_v26, %v47_v24  ;;  %v57_v28 = vmul.f32 %v502_v26, %v48_v25  ;;  %v503_v29 = vld [vmem:[%s884_s2] ss:$0 sm:$0xff]  ;;  %v651_v42 = vld [vmem:[#allocation3 + $0x60] sm:$0xff]   ;;  %s677_s2 = scalar_lea.vmem %s477_s1, 128  ;;  %p682_p9 = scmp.lt.s32.totalorder %s477_s1, %s477_s1 }
  0x23   :  { %586 = vmatpush3.bf16.msra.mxu1 %v636_v11  ;;  %567 = vmatprep.subr.bf16.mxu0 %v731_v2  ;;  %v650_v41 = vld [vmem:[#allocation3 + $0x58] sm:$0xff]   ;;  %p678_p8 = scmp.ne.s32.totalorder %s477_s1, %s677_s2  ;;  %p683_p10 = scmp.lt.s32.totalorder %s677_s2, %s677_s2 }
  0x24   :  { %587 = vmatprep.subr.bf16.mxu1 %v731_v2  ;;  %437 = vperm.xlu1 %630, %v433_v23   ;;  %v65_v30 = vadd.f32 %v503_v29, %v56_v27  ;;  %v66_v31 = vadd.f32 %v503_v29, %v57_v28  ;;  %v654_v45 = vld [vmem:[#allocation3 + $0x78] sm:$0xff]  }
  0x25   :  { %p684_p11 = por %p683_p10, %p682_p9 }
  0x26   :  { %568 = vmatpush3.bf16.msra.mxu0 %v637_v12  ;;  %vm67_vm1 = vcmp.gt.f32.partialorder %v65_v30, 0.0  ;;  %vm68_vm2 = vcmp.gt.f32.partialorder %v66_v31, 0.0 }
  0x27   :  { %588 = vmatpush3.bf16.msra.mxu1 %v638_v13  ;;  %569 = vmatprep.subr.bf16.mxu0 %v731_v2  ;;  %p685_p12 = pnand %p684_p11, %p678_p8 }
  0x28   :  { %589 = vmatprep.subr.bf16.mxu1 %v731_v2 }
  0x2a   :  { %570 = vmatpush3.bf16.msra.mxu0 %v639_v14 }
  0x2b   :  { %590 = vmatpush3.bf16.msra.mxu1 %v640_v15  ;;  %571 = vmatprep.subr.bf16.mxu0 %v731_v2 }
  0x2c   :  { %591 = vmatprep.subr.bf16.mxu1 %v731_v2 }
  0x2e   :  { %572 = vmatpush3.bf16.msra.mxu0 %v641_v16 }
  0x2f   :  { %592 = vmatpush3.bf16.msra.mxu1 %v642_v17  ;;  %573 = vmatprep.subr.bf16.mxu0 %v731_v2 }
  0x30   :  { %593 = vmatprep.subr.bf16.mxu1 %v731_v2 }
  0x32   :  { %574 = vmatpush3.bf16.msra.mxu0 %v643_v18 }
  0x33   :  { %594 = vmatpush3.bf16.msra.mxu1 %v644_v19  ;;  %575 = vmatprep.subr.bf16.mxu0 %v731_v2 }
  0x34   :  { %595 = vmatprep.subr.bf16.mxu1 %v731_v2 }
  0x36   :  { %576 = vmatpush3.bf16.msra.mxu0 %v645_v20 }
  0x37   :  { %596 = vmatpush3.bf16.msra.mxu1 %v646_v21  ;;  %601 = vmatprep.subr.bf16.mxu0 %v731_v2 }
  0x99   :  { %v77_v32 = vpop.permute.xlu0 %76 }
  0x9a   :  { %v79_v33 = vmul.f32 %v77_v32, %v65_v30  ;;  %v80_v34 = vmul.f32 %v77_v32, %v66_v31 }
  0x9c   :  { %v81_v35 = vsel %vm67_vm1, %v65_v30, %v79_v33  ;;  %v82_v36 = vsel %vm68_vm2, %v66_v31, %v80_v34 }
  0x9d   :  { %v83_v38 = vpack.c.bf16 %v82_v36, %v81_v35  ;;  %v326_v61 = vpop.permute.xlu0 %325 }
  0x9f   :  { %578 = vmatmul.mubr.bf16.vlgmr.msra.gmra.mrb[0].mxu0 %v83_v38  ;;  %598 = vmatmul.mubr.bf16.vlgmr.msra.gmra.mrb[0].mxu1 %v83_v38  ;;  %v331_v60 = vpop.permute.xlu1 %330 }
  0xa0   :  { %602 = vmatpush3.bf16.msra.mxu0 %v647_v37  ;;  %617 = vmatprep.mubr.msk.bf16.mxu0 %vm732_vm0, %v731_v2 }
  0xa1   :  { %603 = vmatprep.subr.bf16.mxu0 %v731_v2  ;;  %v443_v7 = vpop.permute.xlu0 %442 }
  0xa3   :  { %v438_v63 = vpop.permute.xlu1 %437 }
  0xa4   :  { %604 = vmatpush3.bf16.msra.mxu0 %v648_v39 }
  0xa5   :  { %605 = vmatprep.subr.bf16.mxu0 %v731_v2 }
  0xa8   :  { %606 = vmatpush3.bf16.msra.mxu0 %v649_v40 }
  0xa9   :  { %607 = vmatprep.subr.bf16.mxu0 %v731_v2 }
  0xac   :  { %608 = vmatpush3.bf16.msra.mxu0 %v650_v41 }
  0xad   :  { %609 = vmatprep.subr.bf16.mxu0 %v731_v2 }
  0xb0   :  { %610 = vmatpush3.bf16.msra.mxu0 %v651_v42 }
  0xb1   :  { %611 = vmatprep.subr.bf16.mxu0 %v731_v2 }
  0xb4   :  { %612 = vmatpush3.bf16.msra.mxu0 %v652_v43 }
  0xb5   :  { %613 = vmatprep.subr.bf16.mxu0 %v731_v2 }
  0xb8   :  { %614 = vmatpush3.bf16.msra.mxu0 %v653_v44 }
  0xb9   :  { %615 = vmatprep.subr.bf16.mxu0 %v731_v2 }
  0xbc   :  { %616 = vmatpush3.bf16.msra.mxu0 %v654_v45 }
  0xbf   :  { %618 = vmatmul.mubr.bf16.vlgmr.msra.gmra.mrb[4].mxu0 %v83_v38 }
 0x172   :  { %v199_v46 = vpop.f32.mrb[0].mxu0  ;;  %v305_v47 = vpop.f32.mrb[0].mxu1 }
 0x173   :  { %v579_v48 = vpop.f32.mrb[1].mxu0  ;;  %v599_v49 = vpop.f32.mrb[1].mxu1  ;;  %v315_v52 = vrot.slane %v199_v46, 7  ;;  %v427_v53 = vrot.slane %v305_v47, 1 }
 0x174   :  { %v202_v50 = vpop.f32.mrb[2].mxu0  ;;  %v308_v51 = vpop.f32.mrb[2].mxu1 }
 0x175   :  { %v316_v54 = vrot.slane %v202_v50, 7  ;;  %v428_v55 = vrot.slane %v308_v51, 1  ;;  %v580_v56 = vpop.f32.mrb[3].mxu0  ;;  %v600_v57 = vpop.f32.mrb[3].mxu1  ;;  %v320_v62 = vsel %vm314_vm4, 0.0, %v315_v52 }
 0x176   :  { %v333_v0 = vmul.f32 %v326_v61, %v320_v62 }
 0x177   :  { %v429_v58 = vsel %vm426_vm3, %v427_v53, %v428_v55  ;;  %v317_v59 = vsel %vm314_vm4, %v315_v52, %v316_v54  ;;  %v432_v1 = vsel %vm426_vm3, %v428_v55, 0.0 }
 0x178   :  { %v445_v3 = vmul.f32 %v438_v63, %v429_v58  ;;  %v334_v6 = vmul.f32 %v331_v60, %v317_v59  ;;  %v446_v9 = vmul.f32 %v443_v7, %v432_v1 }
 0x192   :  { %v417_v2 = vpop.f32.mrb[4].mxu0 }
 0x193   :  { %v418_v4 = vadd.f32 %v417_v2, %v333_v0  ;;  %v619_v5 = vpop.f32.mrb[5].mxu0 }
 0x194   :  { %v420_v8 = vpop.f32.mrb[6].mxu0 }
 0x195   :  { %v447_v10 = vadd.f32 %v445_v3, %v418_v4  ;;  %v421_v11 = vadd.f32 %v420_v8, %v334_v6  ;;  %v620_v12 = vpop.f32.mrb[7].mxu0 }
 0x197   :  { %v448_v13 = vadd.f32 %v446_v9, %v421_v11  ;;  %v460_v14 = vmul.f32 %v447_v10, %v447_v10 }
 0x199   :  { %v453_v15 = vadd.f32 %v448_v13, %v447_v10  ;;  %v461_v16 = vmul.f32 %v448_v13, %v448_v13  ;;  %v532_v17 = vpack.c.bf16 %v448_v13, %v447_v10 }
 0x19b   :  { %v454_v18 = vrot.slane %v453_v15, 4  ;;  %v462_v19 = vadd.f32 %v461_v16, %v460_v14  ;;  %533 = vst [vmem:[#allocation6] sm:$0xff] %v532_v17  }
 0x19c   :  { %688 = shalt.err (!%p685_p12)
}
 0x19d   :  { %s689_s13 = scalar_lea.hbm %s889_s7, 128 }
 0x19e   :  { %p690_p13 = scmp.ne.s32.totalorder %s889_s7, %s689_s13  ;;  %p693_p0 = scmp.lt.u32.totalorder %s689_s13, %s889_s7 }
 0x1a0   :  { %p695_p1 = pnand %p693_p0, %p690_p13 }
 0x1a2   :  { %698 = shalt.err (!%p695_p1)
}
 0x1a3   :  { %482 = dma.vmem_to_hbm [thread:$0]  %s477_s1, 128, %s889_s7, [#allocation5], %s728_s16, %s728_s16, %s729_s17   ;;  %v455_v20 = vadd.f32 %v454_v18, %v453_v15  ;;  %v463_v21 = vrot.slane %v462_v19, 4 }
 0x1a4   :  { %s734_s21 = smov [#allocation7]  }
 0x1a5   :  { %v456_v22 = vrot.slane %v455_v20, 2  ;;  %v464_v23 = vadd.f32 %v463_v21, %v462_v19  ;;  %s489_s6 = sshll.u32 %s734_s21, 4  ;;  %s490_s6 = int_to_ptr.vmem [resolvable:$true] %s489_s6 }
 0x1a6   :  { %s699_s22 = scalar_lea.vmem %s490_s6, 32  ;;  %p704_p3 = scmp.lt.s32.totalorder %s490_s6, %s490_s6 }
 0x1a7   :  { %v457_v24 = vadd.f32 %v456_v22, %v455_v20  ;;  %v465_v25 = vrot.slane %v464_v23, 2  ;;  %p700_p2 = scmp.ne.s32.totalorder %s490_s6, %s699_s22  ;;  %p705_p4 = scmp.lt.s32.totalorder %s699_s22, %s699_s22 }
 0x1a9   :  { %v458_v26 = vrot.slane %v457_v24, 1  ;;  %v466_v27 = vadd.f32 %v465_v25, %v464_v23  ;;  %p706_p5 = por %p705_p4, %p704_p3 }
 0x1ab   :  { %v467_v28 = vrot.slane %v466_v27, 1  ;;  %v459_v29 = vadd.f32 %v458_v26, %v457_v24  ;;  %p707_p6 = pnand %p706_p5, %p700_p2 }
 0x1ad   :  { %v468_v30 = vadd.f32 %v467_v28, %v466_v27 }
 0x1af   :  { %v469_v31 = vsel %vm314_vm4, %v459_v29, %v468_v30 }
 0x1b0   :  { %470 = vst [vmem:[#allocation7] sm:$0x3] %v469_v31 }
 0x1b1   :  { %710 = shalt.err (!%p707_p6)
}
 0x1b2   :  { %s711_s17 = scalar_lea.hbm %s890_s8, 32 }
 0x1b3   :  { %p712_p7 = scmp.ne.s32.totalorder %s890_s8, %s711_s17  ;;  %p715_p8 = scmp.lt.u32.totalorder %s711_s17, %s890_s8 }
 0x1b5   :  { %p717_p9 = pnand %p715_p8, %p712_p7 }
 0x1b7   :  { %720 = shalt.err (!%p717_p9)
}
 0x1b8   :  { %492 = dma.vmem_to_hbm [thread:$0]  %s490_s6, 32, %s890_s8, [#allocation8]  }
 0x1b9   :  { %723 = dma.done.wait [#allocation5], 128  }
 0x1ba   :  { %724 = vsyncadd [#allocation5], 4294967168 }
 0x1bb   :  { %725 = dma.done.wait [#allocation8], 32  }
 0x1bc   :  { %726 = vsyncadd [#allocation8], 4294967264 }
 0x1bd   :  { %499 = vsyncpa [#allocation4], 1 }
 0x1be   :  { %500 = vsyncpa [#allocation5], 1 }
 0x1bf   :  { %501 = vsyncpa [#allocation8], 1 }

</bundles_post_ra>
